<compile_context>
chip_gen: v5e
topology: v5e:2x2
jax: 0.10.0
libtpu: 0.0.40
codegen_flags: <defaults>
</compile_context>

<pallas_src>
import functools

import jax
import jax.numpy as jnp
from jax.experimental import pallas as pl
from jax.experimental.pallas import tpu as pltpu

BN_EPS = 1e-5


def _round_up(n, m):
    return (n + m - 1) // m * m


def _batch_sums(a, mxu_stats):
    """Per-feature sums over the batch (sublane) axis of a (B_pad, F) f32 array
    whose padded rows are exactly zero.

    MXU path (production batches): ones(8, B_pad) @ a -> one vmatmul, keeps the
    XLU free.  XLU path (tiny batches): plain sublane reduction.
    """
    if mxu_stats:
        ones = jnp.ones((8, a.shape[0]), jnp.float32)
        return jnp.dot(ones, a, preferred_element_type=jnp.float32)[0:1, :]
    return jnp.sum(a, axis=0, keepdims=True)


def _global_embedding_kernel(x_ref, w1_ref, bn1_ref, w2_ref, o_ref, acc_ref, *,
                             batch, matmul_dtype, mxu_stats):
    k = pl.program_id(1)

    @pl.when(k == 0)
    def _():
        acc_ref[...] = jnp.zeros_like(acc_ref)

    b_pad = x_ref.shape[0]
    inv_b = 1.0 / batch

    # ---- Linear 1 (MXU).  Bias dropped: cancelled by BN1 mean subtraction.
    h = jnp.dot(x_ref[...], w1_ref[...], preferred_element_type=jnp.float32)

    # ---- BN1 (train mode, biased batch var) via single-pass sufficient stats.
    #      Padded batch rows of h are exactly zero (zero x rows, no bias), so
    #      unmasked sums divided by the real batch size are exact.
    sums1 = _batch_sums(h, mxu_stats)
    ssq1 = _batch_sums(h * h, mxu_stats)
    mean1 = sums1 * inv_b
    var1 = jnp.maximum(ssq1 * inv_b - mean1 * mean1, 0.0)
    gamma1 = bn1_ref[0:1, :]
    beta1 = bn1_ref[1:2, :]
    s1 = gamma1 * jax.lax.rsqrt(var1 + BN_EPS)   # (1, hid_t)
    t1 = beta1 - mean1 * s1                      # (1, hid_t)

    # ---- Fused BN1 scale/shift + ReLU (VPU).
    h = jnp.maximum(h * s1 + t1, 0.0)
    if b_pad != batch:
        # The BN shift made padded batch rows nonzero; re-zero them so the
        # accumulator's padded rows stay 0 and BN2 sums need no masking.
        valid = (jax.lax.broadcasted_iota(jnp.int32, (b_pad, 1), 0)
                 < batch).astype(h.dtype)
        h = h * valid

    # ---- Linear 2 (MXU), accumulated across hidden-dim tiles.
    acc_ref[...] += jnp.dot(h.astype(matmul_dtype), w2_ref[...],
                            preferred_element_type=jnp.float32)

    # ---- BN2 (affine=False) + writeback on the last hidden tile.
    @pl.when(k == pl.num_programs(1) - 1)
    def _():
        y = acc_ref[...]
        sums2 = _batch_sums(y, mxu_stats)
        ssq2 = _batch_sums(y * y, mxu_stats)
        mean2 = sums2 * inv_b
        var2 = jnp.maximum(ssq2 * inv_b - mean2 * mean2, 0.0)
        s2 = jax.lax.rsqrt(var2 + BN_EPS)
        o_ref[...] = (y * s2 - mean2 * s2).astype(o_ref.dtype)


@functools.partial(jax.jit,
                   static_argnames=("matmul_dtype", "hid_tile", "num_out_blocks"))
def global_embedding_forward(x, w1, gamma1, beta1, w2, *,
                             matmul_dtype=jnp.bfloat16,
                             hid_tile=None,
                             num_out_blocks=1):
    """x: (B, input_dim) f32 -> (B, output_dim) f32, train-mode BatchNorm.

    Linear biases are intentionally not taken: they are exactly cancelled by
    the BatchNorm mean subtraction that follows each Linear.  `matmul_dtype`
    is the MXU operand dtype (accumulation and BN math are always f32).
    `num_out_blocks > 1` adds a "parallel" grid axis over output features
    (useful on v7x's two TensorCores; Linear1 is recomputed per block).
    """
    B, in_dim = x.shape
    hid = w1.shape[1]
    out_dim = w2.shape[1]
    assert B >= 2, "train-mode BatchNorm needs batch size >= 2"

    matmul_dtype = jnp.dtype(matmul_dtype)
    use_bf16 = matmul_dtype == jnp.bfloat16
    # v6e/v7x MXU is 2x256x256 -> pad feature dims to 256 for bf16 operands;
    # 128 is enough for the f32 path (and for v5e's 4x128x128 MXU).
    lane = 256 if use_bf16 else 128
    sub = 16 if use_bf16 else 8

    in_p = _round_up(in_dim, lane)
    hid_p = _round_up(hid, lane)
    out_p = _round_up(out_dim, lane)
    b_p = _round_up(B, sub)

    # ---- hidden-dim (reduction) tile size: largest lane-multiple divisor of
    #      hid_p that is <= 512 columns.
    if hid_tile is None:
        blocks = hid_p // lane
        target_blocks = max(512 // lane, 1)
        d_best = 1
        for d in range(1, blocks + 1):
            if blocks % d == 0 and d <= target_blocks:
                d_best = d
        hid_t = d_best * lane
    else:
        assert hid_tile % lane == 0 and hid_p % hid_tile == 0, "bad hid_tile"
        hid_t = hid_tile
    n_hid = hid_p // hid_t

    # ---- output-feature blocks (optional "parallel" axis).
    if out_p % (num_out_blocks * lane) != 0:
        num_out_blocks = 1
    out_t = out_p // num_out_blocks

    # ---- wrapper-side pad + cast (bf16 operands are cast HERE, halving DMA
    #      bytes and avoiding in-kernel full-tensor cast passes).
    x_p = jnp.pad(x.astype(matmul_dtype), ((0, b_p - B), (0, in_p - in_dim)))
    w1_p = jnp.pad(w1.astype(matmul_dtype),
                   ((0, in_p - in_dim), (0, hid_p - hid)))
    w2_p = jnp.pad(w2.astype(matmul_dtype),
                   ((0, hid_p - hid), (0, out_p - out_dim)))
    # Packed BN1 affine params: row 0 = gamma (zero-padded -> padded hidden
    # columns stay exactly 0 through BN1), row 1 = beta.
    bn1 = jnp.pad(
        jnp.stack([gamma1.reshape(-1), beta1.reshape(-1)]).astype(jnp.float32),
        ((0, 0), (0, hid_p - hid)))

    mxu_stats = b_p >= 128  # tiny toy batches keep the cheap XLU sum
    kernel = functools.partial(_global_embedding_kernel,
                               batch=B, matmul_dtype=matmul_dtype,
                               mxu_stats=mxu_stats)

    # ---- scheduler hints + scoped-VMEM sizing (v5e default is only 16 MiB).
    bpe = matmul_dtype.itemsize
    flops = (2 * b_p * in_p * hid_p * num_out_blocks   # Linear1 (per out block)
             + 2 * b_p * hid_p * out_p                 # Linear2
             + 4 * 8 * b_p * (hid_p * num_out_blocks + out_p))  # stat matmuls
    bytes_accessed = (b_p * in_p * bpe + in_p * hid_p * bpe + 2 * hid_p * 4
                      + hid_p * out_p * bpe + b_p * out_p * 4)
    vmem_est = (2 * b_p * in_p * bpe
                + 2 * (in_p * hid_t * bpe + 2 * hid_t * 4 + hid_t * out_t * bpe)
                + b_p * out_t * 4            # accumulator scratch
                + 2 * b_p * out_t * 4        # output double buffer
                + 4 * b_p * hid_t * 4)       # h + elementwise temporaries
    vmem_limit = int(min(max(2 * vmem_est, 32 << 20), 48 << 20))

    out = pl.pallas_call(
        kernel,
        out_shape=jax.ShapeDtypeStruct((b_p, out_p), jnp.float32),
        grid_spec=pltpu.PrefetchScalarGridSpec(
            num_scalar_prefetch=0,
            grid=(num_out_blocks, n_hid),
            in_specs=[
                pl.BlockSpec((b_p, in_p), lambda j, k: (0, 0)),     # x resident
                pl.BlockSpec((in_p, hid_t), lambda j, k: (0, k)),   # w1 tile
                pl.BlockSpec((2, hid_t), lambda j, k: (0, k)),      # gamma/beta
                pl.BlockSpec((hid_t, out_t), lambda j, k: (k, j)),  # w2 tile
            ],
            out_specs=pl.BlockSpec((b_p, out_t), lambda j, k: (0, j)),
            scratch_shapes=[pltpu.VMEM((b_p, out_t), jnp.float32)],
        ),
        compiler_params=pltpu.CompilerParams(
            dimension_semantics=("parallel", "arbitrary"),
            vmem_limit_bytes=vmem_limit),
        cost_estimate=pl.CostEstimate(
            flops=int(flops),
            transcendentals=int(hid_p * num_out_blocks + out_p),
            bytes_accessed=int(bytes_accessed)),
    )(x_p, w1_p, bn1, w2_p)

    return out[:B, :out_dim]


def _reference(x, w1, b1, gamma1, beta1, w2, b2):
    # Faithful PyTorch-semantics reference, *including* the Linear biases,
    # to verify that dropping them in the kernel is exact.
    h = x @ w1 + b1
    m = h.mean(0, keepdims=True)
    v = ((h - m) ** 2).mean(0, keepdims=True)
    h = (h - m) / jnp.sqrt(v + BN_EPS) * gamma1 + beta1
    h = jnp.maximum(h, 0.0)
    y = h @ w2 + b2
    m2 = y.mean(0, keepdims=True)
    v2 = ((y - m2) ** 2).mean(0, keepdims=True)
    return (y - m2) / jnp.sqrt(v2 + BN_EPS)


if __name__ == "__main__":
    def make_inputs(key, batch, in_dim, hid_dim, out_dim):
        ks = jax.random.split(key, 7)
        x = jax.random.normal(ks[0], (batch, in_dim), jnp.float32)
        b1 = 1.0 / (in_dim ** 0.5)
        w1 = jax.random.uniform(ks[1], (in_dim, hid_dim), jnp.float32, -b1, b1)
        bias1 = jax.random.uniform(ks[2], (1, hid_dim), jnp.float32, -b1, b1)
        b2 = 1.0 / (hid_dim ** 0.5)
        w2 = jax.random.uniform(ks[3], (hid_dim, out_dim), jnp.float32, -b2, b2)
        bias2 = jax.random.uniform(ks[4], (1, out_dim), jnp.float32, -b2, b2)
        gamma1 = 0.5 + jax.random.uniform(ks[5], (hid_dim,), jnp.float32)
        beta1 = 0.1 * jax.random.normal(ks[6], (hid_dim,), jnp.float32)
        return x, w1, bias1, gamma1, beta1, w2, bias2

    # 1) Small shapes, f32 operands: tight check vs. PyTorch-semantics reference.
    batch, input_dim, hidden_dim, output_dim = 8, 32, 64, 32
    x, w1, b1, g1, be1, w2, b2 = make_inputs(jax.random.PRNGKey(0),
                                             batch, input_dim, hidden_dim, output_dim)
    out = jax.block_until_ready(
        global_embedding_forward(x, w1, g1, be1, w2, matmul_dtype=jnp.float32))
    ref = _reference(x, w1, b1, g1[None, :], be1[None, :], w2, b2)
    assert out.shape == (batch, output_dim)
    assert jnp.allclose(out, ref, atol=1e-4, rtol=1e-4), "f32 mismatch vs reference"

    # 2) Default bf16 MXU operands (f32 accumulation / BN math): loose sanity check.
    out_bf = jax.block_until_ready(global_embedding_forward(x, w1, g1, be1, w2))
    assert out_bf.shape == (batch, output_dim)
    assert float(jnp.max(jnp.abs(out_bf - ref))) < 0.25, "bf16 path mismatch"

    # 3) Exercise the hidden-dim reduction grid and the out-feature parallel axis.
    x, w1, b1, g1, be1, w2, b2 = make_inputs(jax.random.PRNGKey(1), 8, 32, 256, 256)
    out = jax.block_until_ready(
        global_embedding_forward(x, w1, g1, be1, w2, matmul_dtype=jnp.float32,
                                 hid_tile=128, num_out_blocks=2))
    ref = _reference(x, w1, b1, g1[None, :], be1[None, :], w2, b2)
    assert out.shape == (8, 256)
    assert jnp.allclose(out, ref, atol=1e-4, rtol=1e-4), "tiled-grid mismatch"

    print("KERNEL_OK")
</pallas_src>

<mosaic_0001>
module attributes {stable_mosaic.version = 11 : i64} {
  func.func @_global_embedding_kernel(%arg0: i32, %arg1: i32, %arg2: memref<8x128xf32, #tpu.memory_space<vmem>>, %arg3: memref<128x128xf32, #tpu.memory_space<vmem>>, %arg4: memref<2x128xf32, #tpu.memory_space<vmem>>, %arg5: memref<128x128xf32, #tpu.memory_space<vmem>>, %arg6: memref<8x128xf32, #tpu.memory_space<vmem>>, %arg7: memref<8x128xf32, #tpu.memory_space<vmem>>) attributes {dimension_semantics = [#tpu.dimension_semantics<parallel>, #tpu.dimension_semantics<arbitrary>], iteration_bounds = array<i64: 1, 1>, scalar_prefetch = 0 : i64, scratch_operands = 1 : i64, tpu.core_type = #tpu.core_type<tc>, window_params = [{pipeline_mode = #tpu.pipeline_mode<synchronous>, transform_indices = @transform_0, window_bounds = array<i64: 8, 128>}, {transform_indices = @transform_1, window_bounds = array<i64: 128, 128>}, {transform_indices = @transform_2, window_bounds = array<i64: 2, 128>}, {transform_indices = @transform_3, window_bounds = array<i64: 128, 128>}, {transform_indices = @transform_4, window_bounds = array<i64: 8, 128>}]} {
    %c0_i32 = arith.constant 0 : i32
    %0 = arith.cmpi eq, %arg1, %c0_i32 : i32
    %1 = arith.extui %0 : i1 to i32
    %c0_i32_0 = arith.constant 0 : i32
    %2 = arith.cmpi ne, %1, %c0_i32_0 : i32
    scf.if %2 {
      %cst_23 = arith.constant 0.000000e+00 : f32
      %41 = vector.broadcast %cst_23 : f32 to vector<8x128xf32>
      %c0_24 = arith.constant 0 : index
      %c0_25 = arith.constant 0 : index
      %42 = vector.load %arg7[%c0_24, %c0_25] : memref<8x128xf32, #tpu.memory_space<vmem>>, vector<8x128xf32>
      tpu.vector_store %arg7[%c0_24, %c0_25], %41 {strides = array<i32>} : memref<8x128xf32, #tpu.memory_space<vmem>>, vector<8x128xf32>,
    } else {
    }
    %c0 = arith.constant 0 : index
    %c0_1 = arith.constant 0 : index
    %3 = vector.load %arg2[%c0, %c0_1] : memref<8x128xf32, #tpu.memory_space<vmem>>, vector<8x128xf32>
    %c0_2 = arith.constant 0 : index
    %c0_3 = arith.constant 0 : index
    %4 = vector.load %arg3[%c0_2, %c0_3] : memref<128x128xf32, #tpu.memory_space<vmem>>, vector<128x128xf32>
    %cst = arith.constant dense<0.000000e+00> : vector<8x128xf32>
    %5 = tpu.matmul %3, %4, %cst {dimension_numbers = #tpu.dot_dimension_numbers<[1], [0], [0], [1], [0, 0, 1, 1], [], []>} : vector<8x128xf32>, vector<128x128xf32>, vector<8x128xf32> -> vector<8x128xf32>
    %cst_4 = arith.constant dense<0.000000e+00> : vector<128xf32>
    %6 = vector.multi_reduction <add>, %5, %cst_4 [0] : vector<8x128xf32> to vector<128xf32>
    %7 = vector.shape_cast %6 : vector<128xf32> to vector<1x128xf32>
    %8 = arith.mulf %5, %5 : vector<8x128xf32>
    %cst_5 = arith.constant dense<0.000000e+00> : vector<128xf32>
    %9 = vector.multi_reduction <add>, %8, %cst_5 [0] : vector<8x128xf32> to vector<128xf32>
    %10 = vector.shape_cast %9 : vector<128xf32> to vector<1x128xf32>
    %cst_6 = arith.constant 1.250000e-01 : f32
    %11 = vector.broadcast %cst_6 : f32 to vector<1x128xf32>
    %12 = arith.mulf %7, %11 : vector<1x128xf32>
    %cst_7 = arith.constant 1.250000e-01 : f32
    %13 = vector.broadcast %cst_7 : f32 to vector<1x128xf32>
    %14 = arith.mulf %10, %13 : vector<1x128xf32>
    %15 = arith.mulf %12, %12 : vector<1x128xf32>
    %16 = arith.subf %14, %15 : vector<1x128xf32>
    %cst_8 = arith.constant 0.000000e+00 : f32
    %17 = vector.broadcast %cst_8 : f32 to vector<1x128xf32>
    %18 = arith.maximumf %16, %17 : vector<1x128xf32>
    %c0_9 = arith.constant 0 : index
    %c0_10 = arith.constant 0 : index
    %19 = vector.load %arg4[%c0_9, %c0_10] : memref<2x128xf32, #tpu.memory_space<vmem>>, vector<1x128xf32>
    %c1 = arith.constant 1 : index
    %c0_11 = arith.constant 0 : index
    %20 = vector.load %arg4[%c1, %c0_11] : memref<2x128xf32, #tpu.memory_space<vmem>>, vector<1x128xf32>
    %cst_12 = arith.constant 9.99999974E-6 : f32
    %21 = vector.broadcast %cst_12 : f32 to vector<1x128xf32>
    %22 = arith.addf %18, %21 : vector<1x128xf32>
    %23 = math.rsqrt %22 : vector<1x128xf32>
    %24 = arith.mulf %19, %23 : vector<1x128xf32>
    %25 = arith.mulf %12, %24 : vector<1x128xf32>
    %26 = arith.subf %20, %25 : vector<1x128xf32>
    %27 = vector.broadcast %24 : vector<1x128xf32> to vector<8x128xf32>
    %28 = arith.mulf %5, %27 : vector<8x128xf32>
    %29 = vector.broadcast %26 : vector<1x128xf32> to vector<8x128xf32>
    %30 = arith.addf %28, %29 : vector<8x128xf32>
    %cst_13 = arith.constant 0.000000e+00 : f32
    %31 = vector.broadcast %cst_13 : f32 to vector<8x128xf32>
    %32 = arith.maximumf %30, %31 : vector<8x128xf32>
    %c0_14 = arith.constant 0 : index
    %c0_15 = arith.constant 0 : index
    %33 = vector.load %arg7[%c0_14, %c0_15] : memref<8x128xf32, #tpu.memory_space<vmem>>, vector<8x128xf32>
    %c0_16 = arith.constant 0 : index
    %c0_17 = arith.constant 0 : index
    %34 = vector.load %arg5[%c0_16, %c0_17] : memref<128x128xf32, #tpu.memory_space<vmem>>, vector<128x128xf32>
    %cst_18 = arith.constant dense<0.000000e+00> : vector<8x128xf32>
    %35 = tpu.matmul %32, %34, %cst_18 {dimension_numbers = #tpu.dot_dimension_numbers<[1], [0], [0], [1], [0, 0, 1, 1], [], []>} : vector<8x128xf32>, vector<128x128xf32>, vector<8x128xf32> -> vector<8x128xf32>
    %36 = arith.addf %33, %35 : vector<8x128xf32>
    %c0_19 = arith.constant 0 : index
    %c0_20 = arith.constant 0 : index
    %37 = vector.load %arg7[%c0_19, %c0_20] : memref<8x128xf32, #tpu.memory_space<vmem>>, vector<8x128xf32>
    tpu.vector_store %arg7[%c0_19, %c0_20], %36 {strides = array<i32>} : memref<8x128xf32, #tpu.memory_space<vmem>>, vector<8x128xf32>,
    %c0_i32_21 = arith.constant 0 : i32
    %38 = arith.cmpi eq, %arg1, %c0_i32_21 : i32
    %39 = arith.extui %38 : i1 to i32
    %c0_i32_22 = arith.constant 0 : i32
    %40 = arith.cmpi ne, %39, %c0_i32_22 : i32
    scf.if %40 {
      %c0_23 = arith.constant 0 : index
      %c0_24 = arith.constant 0 : index
      %41 = vector.load %arg7[%c0_23, %c0_24] : memref<8x128xf32, #tpu.memory_space<vmem>>, vector<8x128xf32>
      %cst_25 = arith.constant dense<0.000000e+00> : vector<128xf32>
      %42 = vector.multi_reduction <add>, %41, %cst_25 [0] : vector<8x128xf32> to vector<128xf32>
      %43 = vector.shape_cast %42 : vector<128xf32> to vector<1x128xf32>
      %44 = arith.mulf %41, %41 : vector<8x128xf32>
      %cst_26 = arith.constant dense<0.000000e+00> : vector<128xf32>
      %45 = vector.multi_reduction <add>, %44, %cst_26 [0] : vector<8x128xf32> to vector<128xf32>
      %46 = vector.shape_cast %45 : vector<128xf32> to vector<1x128xf32>
      %cst_27 = arith.constant 1.250000e-01 : f32
      %47 = vector.broadcast %cst_27 : f32 to vector<1x128xf32>
      %48 = arith.mulf %43, %47 : vector<1x128xf32>
      %cst_28 = arith.constant 1.250000e-01 : f32
      %49 = vector.broadcast %cst_28 : f32 to vector<1x128xf32>
      %50 = arith.mulf %46, %49 : vector<1x128xf32>
      %51 = arith.mulf %48, %48 : vector<1x128xf32>
      %52 = arith.subf %50, %51 : vector<1x128xf32>
      %cst_29 = arith.constant 0.000000e+00 : f32
      %53 = vector.broadcast %cst_29 : f32 to vector<1x128xf32>
      %54 = arith.maximumf %52, %53 : vector<1x128xf32>
      %cst_30 = arith.constant 9.99999974E-6 : f32
      %55 = vector.broadcast %cst_30 : f32 to vector<1x128xf32>
      %56 = arith.addf %54, %55 : vector<1x128xf32>
      %57 = math.rsqrt %56 : vector<1x128xf32>
      %58 = vector.broadcast %57 : vector<1x128xf32> to vector<8x128xf32>
      %59 = arith.mulf %41, %58 : vector<8x128xf32>
      %60 = arith.mulf %48, %57 : vector<1x128xf32>
      %61 = vector.broadcast %60 : vector<1x128xf32> to vector<8x128xf32>
      %62 = arith.subf %59, %61 : vector<8x128xf32>
      %c0_31 = arith.constant 0 : index
      %c0_32 = arith.constant 0 : index
      %63 = vector.load %arg6[%c0_31, %c0_32] : memref<8x128xf32, #tpu.memory_space<vmem>>, vector<8x128xf32>
      tpu.vector_store %arg6[%c0_31, %c0_32], %62 {strides = array<i32>} : memref<8x128xf32, #tpu.memory_space<vmem>>, vector<8x128xf32>,
    } else {
    }
    return
  }
  func.func @transform_0(%arg0: i32, %arg1: i32) -> (i32, i32) {
    %c0_i32 = arith.constant 0 : i32
    %c0_i32_0 = arith.constant 0 : i32
    %c0_i32_1 = arith.constant 0 : i32
    return %c0_i32, %c0_i32_0 : i32, i32
  }
  func.func @transform_1(%arg0: i32, %arg1: i32) -> (i32, i32) {
    %c0_i32 = arith.constant 0 : i32
    %c0_i32_0 = arith.constant 0 : i32
    return %c0_i32, %arg1 : i32, i32
  }
  func.func @transform_2(%arg0: i32, %arg1: i32) -> (i32, i32) {
    %c0_i32 = arith.constant 0 : i32
    %c0_i32_0 = arith.constant 0 : i32
    return %c0_i32, %arg1 : i32, i32
  }
  func.func @transform_3(%arg0: i32, %arg1: i32) -> (i32, i32) {
    %c0_i32 = arith.constant 0 : i32
    return %arg1, %arg0 : i32, i32
  }
  func.func @transform_4(%arg0: i32, %arg1: i32) -> (i32, i32) {
    %c0_i32 = arith.constant 0 : i32
    %c0_i32_0 = arith.constant 0 : i32
    return %c0_i32, %arg0 : i32, i32
  }
}

</mosaic_0001>

<bundles_post_ra>
// kernel: global_embedding_forward.1
= control target key start
LH: loop header
LB: loop body
LE: loop exit
PB: predicated region body
PF: predicated region fallthrough
CT: control target
= control target key end

     0   :  { %s356_s0 = inlined_call_operand.vmem [shape: f32[8,128], index: 0, kind: input, shape index: {}]   ;;  %s357_s1 = inlined_call_operand.vmem [shape: f32[128,128], index: 1, kind: input, shape index: {}]   ;;  %s358_s2 = inlined_call_operand.vmem [shape: f32[2,128], index: 2, kind: input, shape index: {}]   ;;  %s359_s3 = inlined_call_operand.vmem [shape: f32[128,128], index: 3, kind: input, shape index: {}]   ;;  %s360_s4 = inlined_call_operand.hbm [shape: f32[8,128], index: 4, kind: output, shape index: {}]  }
   0x1   :  { %v39_v0 = vld [vmem:[%s357_s1 + $0x78] sm:$0xff]  ;;  %v38_v1 = vld [vmem:[%s357_s1 + $0x70] sm:$0xff]  ;;  %v37_v2 = vld [vmem:[%s357_s1 + $0x68] sm:$0xff] }
   0x2   :  { %40 = vmatpush.msra.mxu0 %v39_v0  ;;  %v36_v3 = vld [vmem:[%s357_s1 + $0x60] sm:$0xff] }
   0x4   :  { %41 = vmatpush.msra.mxu0 %v38_v1 }
   0x6   :  { %42 = vmatpush.msra.mxu0 %v37_v2 }
   0x7   :  { %9 = vsyncpa [#allocation4], 0  ;;  %v35_v4 = vld [vmem:[%s357_s1 + $0x58] sm:$0xff]  ;;  %v34_v5 = vld [vmem:[%s357_s1 + $0x50] sm:$0xff]  ;;  %s182_s5 = sshll.u32 %s360_s4, 4  ;;  %s183_s5 = int_to_ptr.hbm [resolvable:$true] %s182_s5 }
   0x8   :  { %43 = vmatpush.msra.mxu0 %v36_v3  ;;  %v33_v6 = vld [vmem:[%s357_s1 + $0x48] sm:$0xff]  ;;  %v32_v7 = vld [vmem:[%s357_s1 + $0x40] sm:$0xff]  ;;  %v31_v8 = vld [vmem:[%s357_s1 + $0x38] sm:$0xff] }
   0x9   :  { %v30_v9 = vld [vmem:[%s357_s1 + $0x30] sm:$0xff]  ;;  %v29_v10 = vld [vmem:[%s357_s1 + $0x28] sm:$0xff]  ;;  %v28_v11 = vld [vmem:[%s357_s1 + $0x20] sm:$0xff] }
   0xa   :  { %44 = vmatpush.msra.mxu0 %v35_v4  ;;  %v27_v12 = vld [vmem:[%s357_s1 + $0x18] sm:$0xff]  ;;  %v26_v13 = vld [vmem:[%s357_s1 + $0x10] sm:$0xff]  ;;  %v25_v14 = vld [vmem:[%s357_s1 + $0x8] sm:$0xff] }
   0xb   :  { %v24_v15 = vld [vmem:[%s357_s1] sm:$0xff]  ;;  %v115_v17 = vld [vmem:[%s359_s3 + $0x78] sm:$0xff]  ;;  %v114_v18 = vld [vmem:[%s359_s3 + $0x70] sm:$0xff] }
   0xc   :  { %45 = vmatpush.msra.mxu0 %v34_v5  ;;  %v23_v16 = vld [vmem:[%s356_s0] sm:$0xff]  ;;  %116 = vmatpush.msra.mxu1 %v115_v17  ;;  %v113_v19 = vld [vmem:[%s359_s3 + $0x68] sm:$0xff]  ;;  %v111_v21 = vld [vmem:[%s359_s3 + $0x58] sm:$0xff] }
   0xd   :  { %v112_v20 = vld [vmem:[%s359_s3 + $0x60] sm:$0xff]  ;;  %v110_v22 = vld [vmem:[%s359_s3 + $0x50] sm:$0xff]  ;;  %v109_v26 = vld [vmem:[%s359_s3 + $0x48] sm:$0xff] }
   0xe   :  { %46 = vmatpush.msra.mxu0 %v33_v6  ;;  %117 = vmatpush.msra.mxu1 %v114_v18  ;;  %v108_v29 = vld [vmem:[%s359_s3 + $0x40] sm:$0xff]  ;;  %v107_v32 = vld [vmem:[%s359_s3 + $0x38] sm:$0xff]  ;;  %v106_v35 = vld [vmem:[%s359_s3 + $0x30] sm:$0xff] }
   0xf   :  { %v105_v38 = vld [vmem:[%s359_s3 + $0x28] sm:$0xff]  ;;  %v104_v41 = vld [vmem:[%s359_s3 + $0x20] sm:$0xff]  ;;  %v103_v44 = vld [vmem:[%s359_s3 + $0x18] sm:$0xff] }
  0x10   :  { %47 = vmatpush.msra.mxu0 %v32_v7  ;;  %118 = vmatpush.msra.mxu1 %v113_v19  ;;  %v102_v45 = vld [vmem:[%s359_s3 + $0x10] sm:$0xff]  ;;  %v101_v48 = vld [vmem:[%s359_s3 + $0x8] sm:$0xff]  ;;  %v100_v50 = vld [vmem:[%s359_s3] sm:$0xff] }
  0x11   :  { %v78_v58 = vld [vmem:[%s358_s2] sm:$0x1]  ;;  %v79_v62 = vld [vmem:[%s358_s2 + $0x1] sm:$0x1]  ;;  %s222_s2 = smov [#allocation3]  }
  0x12   :  { %48 = vmatpush.msra.mxu0 %v31_v8  ;;  %119 = vmatpush.msra.mxu1 %v112_v20  ;;  %s180_s29 = sshll.u32 %s222_s2, 4  ;;  %s181_s29 = int_to_ptr.vmem [resolvable:$true] %s180_s29 }
  0x14   :  { %49 = vmatpush.msra.mxu0 %v30_v9  ;;  %120 = vmatpush.msra.mxu1 %v111_v21 }
  0x16   :  { %50 = vmatpush.msra.mxu0 %v29_v10  ;;  %121 = vmatpush.msra.mxu1 %v110_v22 }
  0x18   :  { %51 = vmatpush.msra.mxu0 %v28_v11  ;;  %122 = vmatpush.msra.mxu1 %v109_v26 }
  0x1a   :  { %52 = vmatpush.msra.mxu0 %v27_v12  ;;  %123 = vmatpush.msra.mxu1 %v108_v29 }
  0x1c   :  { %53 = vmatpush.msra.mxu0 %v26_v13  ;;  %124 = vmatpush.msra.mxu1 %v107_v32 }
  0x1e   :  { %54 = vmatpush.msra.mxu0 %v25_v14  ;;  %125 = vmatpush.msra.mxu1 %v106_v35 }
  0x20   :  { %55 = vmatpush.msra.mxu0 %v24_v15  ;;  %126 = vmatpush.msra.mxu1 %v105_v38 }
  0x21   :  { %56 = vmatmul.f32.vlgmr.msra.gmra.mxu0 %v23_v16 }
  0x22   :  { %127 = vmatpush.msra.mxu1 %v104_v41 }
  0x24   :  { %128 = vmatpush.msra.mxu1 %v103_v44 }
  0x26   :  { %129 = vmatpush.msra.mxu1 %v102_v45 }
  0x28   :  { %130 = vmatpush.msra.mxu1 %v101_v48 }
  0x2a   :  { %131 = vmatpush.msra.mxu1 %v100_v50 }
  0x9e   :  { %v57_v23 = vpop.f32.mrf.mxu0 }
  0x9f   :  { %v60_v24 = vrot.slane %v57_v23, 4  ;;  %v66_v25 = vmul.f32 %v57_v23, %v57_v23 }
  0xa1   :  { %v61_v27 = vadd.f32 %v60_v24, %v57_v23  ;;  %v67_v28 = vrot.slane %v66_v25, 4 }
  0xa3   :  { %v62_v30 = vrot.slane %v61_v27, 2  ;;  %v68_v31 = vadd.f32 %v67_v28, %v66_v25 }
  0xa5   :  { %v63_v33 = vadd.f32 %v62_v30, %v61_v27  ;;  %v69_v34 = vrot.slane %v68_v31, 2 }
  0xa7   :  { %v64_v36 = vrot.slane %v63_v33, 1  ;;  %v70_v37 = vadd.f32 %v69_v34, %v68_v31 }
  0xa9   :  { %v65_v39 = vadd.f32 %v64_v36, %v63_v33  ;;  %v71_v40 = vrot.slane %v70_v37, 1 }
  0xab   :  { %v72_v42 = vadd.f32 %v71_v40, %v70_v37  ;;  %v73_v43 = vmul.f32 0.125, %v65_v39 }
  0xad   :  { %v74_v46 = vmul.f32 0.125, %v72_v42  ;;  %v75_v47 = vmul.f32 %v73_v43, %v73_v43 }
  0xaf   :  { %v76_v49 = vsub.f32 %v74_v46, %v75_v47 }
  0xb1   :  { %v77_v51 = vmax.f32 %v76_v49, 0.0 }
  0xb3   :  { %v80_v52 = vadd.f32 1e-05, %v77_v51 }
  0xb5   :  { %192 = vrsqrt.f32 %v80_v52  ;;  %vm87_vm1 = vweird.f32 %v80_v52 }
  0xbb   :  { %v193_v53 = vpop.eup %192 }
  0xbc   :  { %v82_v54 = vmul.f32 %v193_v53, %v80_v52  ;;  %vm88_vm0 = vweird.f32 %v193_v53 }
  0xbd   :  { %vm89_vm2 = vmor %vm87_vm1, %vm88_vm0 }
  0xbe   :  { %v83_v55 = vmul.f32 %v193_v53, %v82_v54 }
  0xc0   :  { %v84_v56 = vmul.f32 0.5, %v83_v55 }
  0xc2   :  { %v85_v57 = vsub.f32 1.5, %v84_v56 }
  0xc4   :  { %v86_v59 = vmul.f32 %v193_v53, %v85_v57 }
  0xc6   :  { %v90_v60 = vsel %vm89_vm2, %v193_v53, %v86_v59 }
  0xc7   :  { %v91_v61 = vmul.f32 %v90_v60, %v78_v58 }
  0xc9   :  { %v94_v63 = vperm.slane %v91_v61, 0  ;;  %v92_v0 = vmul.f32 %v91_v61, %v73_v43 }
  0xcb   :  { %v93_v1 = vsub.f32 %v79_v62, %v92_v0  ;;  %v95_v2 = vmul.f32 %v94_v63, %v57_v23 }
  0xcd   :  { %v96_v3 = vperm.slane %v93_v1, 0 }
  0xcf   :  { %v97_v4 = vadd.f32 %v96_v3, %v95_v2 }
  0xd1   :  { %v98_v5 = vmax.f32 %v97_v4, 0.0 }
  0xd3   :  { %132 = vmatmul.f32.vlgmr.msra.gmra.mxu1 %v98_v5 }
 0x150   :  { %v133_v6 = vpop.f32.mrf.mxu1 }
 0x151   :  { %v142_v7 = vrot.slane %v133_v6, 4  ;;  %v148_v8 = vmul.f32 %v133_v6, %v133_v6 }
 0x153   :  { %v143_v9 = vadd.f32 %v142_v7, %v133_v6  ;;  %v149_v10 = vrot.slane %v148_v8, 4 }
 0x155   :  { %v144_v11 = vrot.slane %v143_v9, 2  ;;  %v150_v12 = vadd.f32 %v149_v10, %v148_v8 }
 0x157   :  { %v145_v13 = vadd.f32 %v144_v11, %v143_v9  ;;  %v151_v14 = vrot.slane %v150_v12, 2 }
 0x159   :  { %v146_v15 = vrot.slane %v145_v13, 1  ;;  %v152_v16 = vadd.f32 %v151_v14, %v150_v12 }
 0x15b   :  { %v147_v17 = vadd.f32 %v146_v15, %v145_v13  ;;  %v153_v18 = vrot.slane %v152_v16, 1 }
 0x15d   :  { %v154_v19 = vadd.f32 %v153_v18, %v152_v16  ;;  %v155_v20 = vmul.f32 0.125, %v147_v17 }
 0x15f   :  { %v156_v21 = vmul.f32 0.125, %v154_v19  ;;  %v157_v22 = vmul.f32 %v155_v20, %v155_v20 }
 0x161   :  { %v158_v23 = vsub.f32 %v156_v21, %v157_v22 }
 0x163   :  { %v159_v24 = vmax.f32 %v158_v23, 0.0 }
 0x165   :  { %v160_v25 = vadd.f32 1e-05, %v159_v24 }
 0x167   :  { %194 = vrsqrt.f32 %v160_v25  ;;  %vm167_vm4 = vweird.f32 %v160_v25 }
 0x16d   :  { %v195_v26 = vpop.eup %194 }
 0x16e   :  { %v162_v27 = vmul.f32 %v195_v26, %v160_v25  ;;  %vm168_vm3 = vweird.f32 %v195_v26 }
 0x16f   :  { %vm169_vm5 = vmor %vm167_vm4, %vm168_vm3 }
 0x170   :  { %v163_v28 = vmul.f32 %v195_v26, %v162_v27 }
 0x172   :  { %v164_v29 = vmul.f32 0.5, %v163_v28 }
 0x174   :  { %v165_v30 = vsub.f32 1.5, %v164_v29 }
 0x176   :  { %v166_v31 = vmul.f32 %v195_v26, %v165_v30 }
 0x178   :  { %v170_v32 = vsel %vm169_vm5, %v195_v26, %v166_v31 }
 0x179   :  { %v171_v33 = vmul.f32 %v170_v32, %v133_v6  ;;  %v172_v34 = vmul.f32 %v170_v32, %v155_v20 }
 0x17b   :  { %v173_v35 = vsub.f32 %v171_v33, %v172_v34 }
 0x17d   :  { %174 = vst [vmem:[#allocation3] sm:$0xff] %v173_v35 }
 0x17e   :  { %185 = dma.vmem_to_hbm [thread:$0]  %s181_s29, 128, %s183_s5, [#allocation4]  }
 0x17f   :  { %220 = dma.done.wait [#allocation4], 128  }
 0x180   :  { %221 = vsyncadd [#allocation4], 4294967168 }
 0x181   :  { %190 = vsyncpa [#allocation4], 1 }

</bundles_post_ra>
